<compile_context>
chip_gen: v5e
topology: v5e:2x2
jax: 0.10.0
libtpu: 0.0.40
codegen_flags: <defaults>
</compile_context>

<pallas_src>
import math
from functools import partial, reduce
from operator import mul

import jax
import jax.numpy as jnp
from jax.experimental import pallas as pl
from jax.experimental.pallas import tpu as pltpu


def _vpt_kernel(x_ref, prompt_ref, out_ref, *, seq_len):
    # x_ref:      (Bb, x_tok, D)  with x_tok == seq_len (aligned fast path)
    #                              or x_tok == L        (fallback, slice here)
    # prompt_ref: (vpt_len, D)     shared / resident across all grid steps
    # out_ref:    (Bb, seq_len + vpt_len, D)
    bb, _, d = out_ref.shape
    vpt_len = prompt_ref.shape[0]
    out_ref[:, :seq_len, :] = x_ref[:, :seq_len, :]
    out_ref[:, seq_len:, :] = jnp.broadcast_to(
        prompt_ref[...][None, :, :], (bb, vpt_len, d)
    )


def _sublane_multiple(dtype):
    itemsize = jnp.dtype(dtype).itemsize
    return max(8, 32 // max(itemsize, 1))  # 8 for f32, 16 for bf16, 32 for int8


def _choose_batch_tile(B, x_tok, total, D, itemsize,
                       target_tile_bytes=2 << 20,
                       vmem_budget_bytes=24 << 20):
    """Pick Bb so the double-buffered (x tile + out tile) stays a few MB per
    step and inside the smallest (v7x) VMEM budget, while keeping >=2 grid
    steps so the parallel batch axis can shard across TensorCores."""
    per_batch = (x_tok + total) * D * itemsize
    Bb = max(1, target_tile_bytes // per_batch)
    while Bb > 1 and 2 * Bb * per_batch > vmem_budget_bytes:
        Bb //= 2
    if B >= 2:
        Bb = min(Bb, pl.cdiv(B, 2))  # leave at least 2 grid steps
    return int(max(1, min(Bb, B)))


def vpt_forward(x, prompt, seq_len):
    """x: [B, L, D] with L >= seq_len; prompt: [vpt_len, D]
       -> [B, seq_len + vpt_len, D] (matches VPT.forward)."""
    B, L, D = x.shape
    vpt_len, Dp = prompt.shape
    assert D == Dp and L >= seq_len
    prompt = prompt.astype(x.dtype)
    total = seq_len + vpt_len
    itemsize = jnp.dtype(x.dtype).itemsize

    # Fast path: the x prefix itself is a legal (sublane-aligned) block, so we
    # only DMA the seq_len tokens we need.  Otherwise take the full-L block and
    # slice inside the kernel (always lowers; correct for any seq_len <= L).
    sub = _sublane_multiple(x.dtype)
    aligned = (seq_len == L) or (seq_len % sub == 0)
    x_tok = seq_len if aligned else L

    Bb = _choose_batch_tile(B, x_tok, total, D, itemsize)
    grid = (pl.cdiv(B, Bb),)

    # Double-buffered footprint (x tile + out tile) plus the resident prompt;
    # request that much scoped VMEM (v5e default is only 16 MiB), capped well
    # below v7x's 64 MiB physical VMEM.
    tile_bytes = Bb * (x_tok + total) * D * itemsize
    needed = 2 * tile_bytes + vpt_len * D * itemsize
    vmem_limit = int(min(max(2 * needed, 16 << 20), 48 << 20))

    kernel = partial(_vpt_kernel, seq_len=seq_len)
    return pl.pallas_call(
        kernel,
        out_shape=jax.ShapeDtypeStruct((B, total, D), x.dtype),
        grid=grid,
        in_specs=[
            pl.BlockSpec((Bb, x_tok, D), lambda b: (b, 0, 0)),
            # Constant block index -> fetched once, stays resident in VMEM.
            pl.BlockSpec((vpt_len, D), lambda b: (0, 0)),
        ],
        out_specs=pl.BlockSpec((Bb, total, D), lambda b: (b, 0, 0)),
        compiler_params=pltpu.CompilerParams(
            dimension_semantics=("parallel",),
            vmem_limit_bytes=vmem_limit,
        ),
    )(x, prompt)


if __name__ == "__main__":
    key = jax.random.PRNGKey(0)
    kx1, kp1, kx2, kp2 = jax.random.split(key, 4)

    def ref_concat(x, prompt, seq_len):
        B = x.shape[0]
        vpt_len, D = prompt.shape
        return jnp.concatenate(
            [x[:, :seq_len, :],
             jnp.broadcast_to(prompt[None].astype(x.dtype), (B, vpt_len, D))],
            axis=1,
        )

    patch_size = (16, 16)

    # --- Config 1: lane-dense D (multiple of 128), sublane-aligned seq_len ---
    B, L, seq_len, vpt_len, D = 8, 12, 8, 8, 128
    init_val = math.sqrt(6.0 / float(3 * reduce(mul, patch_size, 1) + D))
    prompt1 = jax.random.uniform(kp1, (vpt_len, D), jnp.float32, -init_val, init_val)
    x1 = jax.random.normal(kx1, (B, L, D), jnp.float32)
    out1 = jax.block_until_ready(vpt_forward(x1, prompt1, seq_len))
    assert out1.shape == (B, seq_len + vpt_len, D)
    assert jnp.allclose(out1, ref_concat(x1, prompt1, seq_len)), "config1 mismatch"

    # --- Config 2: misaligned seq_len / narrow D -> exercises the full-L
    #     fallback (the case that previously violated the (8,128) rule). ---
    B, L, seq_len, vpt_len, D = 4, 10, 7, 5, 32
    init_val = math.sqrt(6.0 / float(3 * reduce(mul, patch_size, 1) + D))
    prompt2 = jax.random.uniform(kp2, (vpt_len, D), jnp.float32, -init_val, init_val)
    x2 = jax.random.normal(kx2, (B, L, D), jnp.float32)
    out2 = jax.block_until_ready(vpt_forward(x2, prompt2, seq_len))
    assert out2.shape == (B, seq_len + vpt_len, D)
    assert jnp.allclose(out2, ref_concat(x2, prompt2, seq_len)), "config2 mismatch"

    print("KERNEL_OK")
</pallas_src>

<mosaic_0001>
module attributes {stable_mosaic.version = 11 : i64} {
  func.func @_vpt_kernel(%arg0: i32, %arg1: memref<4x8x128xf32, #tpu.memory_space<vmem>>, %arg2: memref<8x128xf32, #tpu.memory_space<vmem>>, %arg3: memref<4x16x128xf32, #tpu.memory_space<vmem>>) attributes {dimension_semantics = [#tpu.dimension_semantics<parallel>], iteration_bounds = array<i64: 2>, scalar_prefetch = 0 : i64, scratch_operands = 0 : i64, tpu.core_type = #tpu.core_type<tc>, window_params = [{transform_indices = @transform_0, window_bounds = array<i64: 4, 8, 128>}, {pipeline_mode = #tpu.pipeline_mode<synchronous>, transform_indices = @transform_1, window_bounds = array<i64: 8, 128>}, {transform_indices = @transform_2, window_bounds = array<i64: 4, 16, 128>}]} {
    %c0 = arith.constant 0 : index
    %c0_0 = arith.constant 0 : index
    %c0_1 = arith.constant 0 : index
    %0 = vector.load %arg1[%c0, %c0_0, %c0_1] : memref<4x8x128xf32, #tpu.memory_space<vmem>>, vector<4x8x128xf32>
    %c0_2 = arith.constant 0 : index
    %c0_3 = arith.constant 0 : index
    %c0_4 = arith.constant 0 : index
    %1 = vector.load %arg3[%c0_2, %c0_3, %c0_4] : memref<4x16x128xf32, #tpu.memory_space<vmem>>, vector<4x8x128xf32>
    tpu.vector_store %arg3[%c0_2, %c0_3, %c0_4], %0 {strides = array<i32>} : memref<4x16x128xf32, #tpu.memory_space<vmem>>, vector<4x8x128xf32>,
    %c0_5 = arith.constant 0 : index
    %c0_6 = arith.constant 0 : index
    %2 = vector.load %arg2[%c0_5, %c0_6] : memref<8x128xf32, #tpu.memory_space<vmem>>, vector<8x128xf32>
    %3 = vector.shape_cast %2 : vector<8x128xf32> to vector<1x8x128xf32>
    %4 = vector.shape_cast %3 : vector<1x8x128xf32> to vector<1x8x128xf32>
    %5 = vector.broadcast %4 : vector<1x8x128xf32> to vector<4x8x128xf32>
    %c0_7 = arith.constant 0 : index
    %c8 = arith.constant 8 : index
    %c0_8 = arith.constant 0 : index
    %6 = vector.load %arg3[%c0_7, %c8, %c0_8] : memref<4x16x128xf32, #tpu.memory_space<vmem>>, vector<4x8x128xf32>
    tpu.vector_store %arg3[%c0_7, %c8, %c0_8], %5 {strides = array<i32>} : memref<4x16x128xf32, #tpu.memory_space<vmem>>, vector<4x8x128xf32>,
    return
  }
  func.func @transform_0(%arg0: i32) -> (i32, i32, i32) {
    %c0_i32 = arith.constant 0 : i32
    %c0_i32_0 = arith.constant 0 : i32
    %c0_i32_1 = arith.constant 0 : i32
    return %arg0, %c0_i32, %c0_i32_0 : i32, i32, i32
  }
  func.func @transform_1(%arg0: i32) -> (i32, i32) {
    %c0_i32 = arith.constant 0 : i32
    %c0_i32_0 = arith.constant 0 : i32
    %c0_i32_1 = arith.constant 0 : i32
    return %c0_i32, %c0_i32_0 : i32, i32
  }
  func.func @transform_2(%arg0: i32) -> (i32, i32, i32) {
    %c0_i32 = arith.constant 0 : i32
    %c0_i32_0 = arith.constant 0 : i32
    %c0_i32_1 = arith.constant 0 : i32
    return %arg0, %c0_i32, %c0_i32_0 : i32, i32, i32
  }
}

</mosaic_0001>

<bundles_post_ra>
// kernel: tpu_custom_call.1
= control target key start
LH: loop header
LB: loop body
LE: loop exit
PB: predicated region body
PF: predicated region fallthrough
CT: control target
= control target key end

     0   :  { %7 = vsyncpa [#allocation4], 0  ;;  %s531_s0 = inlined_call_operand.vmem [shape: f32[8,12,128], index: 0, kind: input, shape index: {}]   ;;  %s532_s1 = inlined_call_operand.vmem [shape: f32[8,128], index: 1, kind: input, shape index: {}]   ;;  %s533_s2 = inlined_call_operand.hbm [shape: f32[8,16,128], index: 2, kind: output, shape index: {}]  }
   0x1   :  { %9 = vsyncpa [#allocation4 + $0x1], 0  ;;  %s433_s9 = smov 0   ;;  %s435_s10 = smov 0  }
   0x2   :  { %s437_s11 = smov 0   ;;  %s439_s12 = smov 0  }
   0x3 LB: > { %s290_s13 = sadd.s32 4294967295, %s414_s12   ;;  %s291_s14 = sadd.s32 4294967294, %s414_s12   ;;  %s414_s12 = sphi %s439_s12, %s539_s12   ;;  %s410_s11 = sphi %s437_s11, %s538_s11   ;;  %s406_s10 = sphi %s435_s10, %s537_s10   ;;  %s402_s9 = sphi %s433_s9, %s536_s9  }
   0x4   : > { %s456_s15 = sadd.s32 1, %s414_s12   ;;  %s22_s16 = sadd.s32 1, %s410_s11 }
   0x5   : > { %s19_s17 = ssub.s32 %s414_s12, %s456_s15  ;;  %p29_p0 = scmp.ne.s32.totalorder %s410_s11, %s406_s10 }
   0x6   : > { %p20_p1 = scmp.eq.s32.totalorder %s19_s17, 0  ;;  %p30_p2 = scmp.eq.s32.totalorder %s414_s12, 0 }
   0x7   : > { %p80_p3 = scmp.eq.s32.totalorder %s290_s13, 1  ;;  %p85_p4 = scmp.ne.s32.totalorder %s406_s10, %s402_s9 }
   0x8   : > { %s469_s18 = scalar_select %p20_p1, %s410_s11, %s22_s16  }
   0x9   : > { %p31_p5 = por %p30_p2, %p29_p0  ;;  %p471_p6 = por %p80_p3, %p29_p0 }
   0xa   : > { %p86_p7 = scmp.eq.s32.totalorder %s291_s14, 1  ;;  %p293_p9 = scmp.ge.s32.totalorder %s414_s12, 2 }
   0xc   : > { %p475_p8 = por %p86_p7, %p85_p4  ;;  %105 = sbr.rel (%p293_p9) target bundleno = 25 (0x19), region = 20 }
  0x11   : > { %108 = sbr.rel (!%p31_p5) target bundleno = 25 (0x19), region = 24  ;;  %s110_s21 = sand.u32 (%p31_p5), 1, %s410_s11  }
  0x12   : > { %s308_s22 = sshll.u32 (%p31_p5), %s414_s12, 6  ;;  %s294_s23 = sshll.u32 (%p31_p5), %s110_s21, 5 }
  0x13   : > { %s116_s26 = scalar_lea.vmem (%p31_p5), %s531_s0, %s308_s22  ;;  %s112_s27 = scalar_lea.vmem (%p31_p5), [#allocation2], %s294_s23 }
  0x14   : > { %v151_v0 = vld [vmem:[%s116_s26] sm:$0xff] (%p31_p5)  ;;  %v153_v1 = vld [vmem:[%s116_s26 + $0x10] sm:$0xff] (%p31_p5) }
  0x15   : > { %v155_v2 = vld [vmem:[%s116_s26 + $0x20] sm:$0xff] (%p31_p5)  ;;  %152 = vst [vmem:[%s112_s27] sm:$0xff] (%p31_p5), %v151_v0  ;;  %v157_v3 = vld [vmem:[%s116_s26 + $0x30] sm:$0xff] (%p31_p5) }
  0x16   : > { %154 = vst [vmem:[%s112_s27 + $0x8] sm:$0xff] %v153_v1 }
  0x17   : > { %156 = vst [vmem:[%s112_s27 + $0x10] sm:$0xff] %v155_v2 }
  0x18   : > { %158 = vst [vmem:[%s112_s27 + $0x18] sm:$0xff] %v157_v3 }
  0x19 PF: > { %p298_p10 = scmp.ge.s32.totalorder %s414_s12, 1  ;;  %p163_p11 = scmp.lt.s32.totalorder %s414_s12, 3 }
  0x1b   : > { %p164_p12 = pnand %p298_p10, %p163_p11 }
  0x1c   : > { %s490_s28 = sand.u32 (!%p164_p12), 1, %s406_s10   ;;  %s310_s3 = sshll.u32 (!%p164_p12), %s290_s13, 6 }
  0x1d   : > { %167 = sbr.rel (%p164_p12) target bundleno = 46 (0x2e), region = 62  ;;  %s299_s4 = sshll.u32 (!%p164_p12), %s490_s28, 5 }
  0x1e   : > { %s300_s5 = sshll.u32 (!%p164_p12), %s490_s28, 6  ;;  %s172_s6 = scalar_lea.vmem (!%p164_p12), [#allocation2], %s299_s4 }
  0x1f   : > { %s190_s7 = scalar_lea.vmem (!%p164_p12), [#allocation3], %s300_s5  ;;  %s219_s17 = scalar_lea.hbm (!%p164_p12), %s533_s2, %s310_s3 }
  0x20   : > { %s220_s8 = sshll.u32 (!%p164_p12), %s190_s7, 4  ;;  %s222_s21 = sshll.u32 (!%p164_p12), %s219_s17, 4  ;;  %s221_s8 = int_to_ptr.vmem [resolvable:$true] %s220_s8  ;;  %s223_s21 = int_to_ptr.hbm [resolvable:$true] %s222_s21 }
  0x21   : > { %s207_s13 = scalar_lea.sflag (!%p164_p12), [#allocation4], %s490_s28  ;;  %s366_s22 = sshra.s32 (!%p164_p12), %s223_s21, 4  ;;  %s367_s22 = int_to_ptr.hbm [resolvable:$true] %s366_s22 }
  0x22   : > { %v201_v4 = vld [vmem:[%s532_s1] sm:$0xff]  ;;  %v194_v6 = vld [vmem:[%s172_s6 + $0x8] sm:$0xff]  ;;  %v195_v7 = vld [vmem:[%s172_s6 + $0x10] sm:$0xff]  ;;  %s368_s23 = scalar_lea.hbm %s367_s22, 64  ;;  %s372_s26 = scalar_lea.hbm %s533_s2, 128 }
  0x23   : > { %v193_v5 = vld [vmem:[%s172_s6] sm:$0xff]  ;;  %202 = vst [vmem:[%s190_s7 + $0x8] sm:$0xff] %v201_v4  ;;  %v196_v8 = vld [vmem:[%s172_s6 + $0x18] sm:$0xff]  ;;  %p369_p13 = scmp.ne.s32.totalorder %s367_s22, %s368_s23  ;;  %p373_p2 = scmp.lt.s32.totalorder %s367_s22, %s533_s2 }
  0x24   : > { %197 = vst [vmem:[%s190_s7] sm:$0xff] %v193_v5  ;;  %p374_p3 = scmp.lt.s32.totalorder %s372_s26, %s368_s23 }
  0x25   : > { %198 = vst [vmem:[%s190_s7 + $0x10] sm:$0xff] %v194_v6  ;;  %p370_p0 = pnand %p369_p13, %p471_p6 }
  0x26   : > { %199 = vst [vmem:[%s190_s7 + $0x20] sm:$0xff] %v195_v7  ;;  %p375_p4 = por %p374_p3, %p373_p2 }
  0x27   : > { %200 = vst [vmem:[%s190_s7 + $0x30] sm:$0xff] %v196_v8  ;;  %p371_p1 = pneg %p370_p0 }
  0x28   : > { %203 = vst [vmem:[%s190_s7 + $0x18] sm:$0xff] %v201_v4 }
  0x29   : > { %204 = vst [vmem:[%s190_s7 + $0x28] sm:$0xff] %v201_v4  ;;  %p376_p5 = pnand %p375_p4, %p371_p1 }
  0x2a   : > { %205 = vst [vmem:[%s190_s7 + $0x38] sm:$0xff] %v201_v4 }
  0x2b   : > { %379 = shalt.err (!%p376_p5)
}
  0x2c   : > { %s416_s28 = smov 128   ;;  %s417_s30 = smov 8  }
  0x2d   : > { %311 = dma.vmem_to_hbm [thread:$0]  (%p471_p6), %s221_s8, 1024, %s223_s21, %s207_s13, %s416_s28, %s416_s28, %s417_s30  }
  0x2e PF: > { %s237_s3 = sand.u32 1, %s402_s9   ;;  %p314_p7 = pnand %p293_p9, %p475_p8 }
  0x2f   : > { %s238_s4 = scalar_lea.sflag [#allocation4], %s237_s3 }
  0x30   : > { %p315_p10 = pneg %p314_p7 }
  0x32   : > { %397 = dma.done.wait (%p315_p10), %s238_s4, 1024  }
  0x33   : > { %399 = vsyncadd (%p315_p10), %s238_s4, 4294966272  ;;  %p12_p11 = scmp.ge.s32.totalorder %s456_s15, 4   ;;  %s536_s9 = smov %s406_s10 }
  0x34   : > { %s537_s10 = smov %s410_s11  ;;  %s538_s11 = smov %s469_s18 }
  0x35   : > { %s539_s12 = smov %s456_s15  ;;  %14 = sbr.rel (!%p12_p11) target bundleno = 3 (0x3), region = 106 }
  0x3a   :  { %244 = vsyncpa [#allocation4], 1 }
  0x3b   :  { %246 = vsyncpa [#allocation4 + $0x1], 1 }

</bundles_post_ra>
